<compile_context>
chip_gen: v6e
topology: v6e:2x2x1
jax: 0.10.0
libtpu: 0.0.40
codegen_flags: <defaults>
</compile_context>

<pallas_src>
import functools

import jax
import jax.numpy as jnp
from jax.experimental import pallas as pl
from jax.experimental.pallas import tpu as pltpu


# ----------------------------------------------------------------------------
# Activation map mirroring ACTIVATION_MAP in the PyTorch module.
# ----------------------------------------------------------------------------
def _leaky_relu(v):
    return jnp.where(v >= 0, v, v * jnp.asarray(0.1, v.dtype))


def _relu6(v):
    return jnp.clip(v, jnp.asarray(0.0, v.dtype), jnp.asarray(6.0, v.dtype))


ACTIVATION_MAP = {
    "logistic": jax.nn.sigmoid,
    "leaky": _leaky_relu,                                       # LeakyReLU(0.1)
    "relu": lambda v: jnp.maximum(v, jnp.asarray(0.0, v.dtype)),
    "relu+": lambda v: jnp.maximum(v, jnp.asarray(0.0, v.dtype)),
    "relu6": _relu6,
    "tanh": jnp.tanh,
    "linear": None,
}


# ----------------------------------------------------------------------------
# Pallas kernel: fused elementwise add + activation (pure VPU/EUP work).
# ----------------------------------------------------------------------------
def _shortcut_kernel(x_ref, other_ref, o_ref, *, act_fn):
    v = x_ref[...] + other_ref[...]
    if act_fn is not None:
        v = act_fn(v)
    o_ref[...] = v.astype(o_ref.dtype)


# ----------------------------------------------------------------------------
# Layout / tile selection.
# ----------------------------------------------------------------------------
_LANE = 128
_MAX_COLS = 1024
_DUAL_CORE_MIN_BYTES = 256 * 1024   # above this, make sure v7x's 2nd TC gets work


def _cdiv(a, b):
    return -(-a // b)


def _round_up(v, m):
    return _cdiv(v, m) * m


def _per_block_budget_bytes():
    # 3 operands x 2 pipeline buffers x block_bytes must stay inside the
    # default scoped-VMEM limit (v5e: 16 MiB, v6e/v7x: 32 MiB) with headroom
    # for Mosaic internal scratch.  The measured add-roofline plateaus around
    # 1 MiB blocks, so the conservative fallback costs ~1% at most.
    try:
        kind = jax.devices()[0].device_kind.lower()
    except Exception:  # pragma: no cover - defensive
        kind = ""
    if any(tag in kind for tag in ("v6", "v7", "trillium")):
        return 4 * 1024 * 1024          # 6 x 4 MiB = 24 MiB  (< 32 MiB default)
    return 3 * 512 * 1024               # 6 x 1.5 MiB = 9 MiB (< 16 MiB, v5e-safe)


def _choose_cols(n):
    """Pick a last-dim width.  Returns (cols, needs_pad)."""
    # Fast path: lane-dense multiple of 128 that divides n exactly.
    for cand in (1024, 896, 768, 640, 512, 384, 256, 128):
        if n % cand == 0:
            return cand, False
    # Otherwise: largest exact divisor of n <= 1024 (masked partial-lane
    # stores, but zero extra HBM traffic from padding).
    best = 1
    d = 1
    while d * d <= n:
        if n % d == 0:
            for c in (d, n // d):
                if c <= _MAX_COLS and c > best:
                    best = c
        d += 1
    if best >= _LANE:
        return best, False
    if n <= _MAX_COLS:
        return n, False                 # tiny tensor: one full-extent row
    # Pathological (e.g. prime-ish n): fall back to padding the flat tail.
    return 512, True


def _dual_core_cost(rows, tile_rows):
    """Rows handled by the busier core if the block grid is split across 2 TCs."""
    g = _cdiv(rows, tile_rows)
    g0 = _cdiv(g, 2)
    rows0 = min(g0 * tile_rows, rows)
    return max(rows0, rows - rows0)


def _choose_tile_rows(rows, cols, itemsize):
    budget = _per_block_budget_bytes()
    row_bytes = cols * itemsize
    pack = max(8, 32 // itemsize)       # f32: 8, bf16: 16, int8/fp8: 32 sublanes

    tile = max(budget // row_bytes, 1)
    if tile >= rows:
        tile = rows                     # full-extent block is always legal
    else:
        tile = max((tile // pack) * pack, 8)

    operand_bytes = rows * cols * itemsize
    if operand_bytes < _DUAL_CORE_MIN_BYTES or rows <= 8:
        return max(tile, 1)

    g = _cdiv(rows, tile)
    if g == 1:
        # Split into 2 blocks so v7x's second TensorCore gets work; two extra
        # ~0.35 us grid steps are negligible against HBM time at this size.
        tile = min(_round_up(_cdiv(rows, 2), pack), rows)
    elif g % 2 == 1 and g < 16:
        # Prefer an even block count for balanced dual-core sharding, but only
        # if it actually improves the contiguous-split balance.
        alt = min(_round_up(_cdiv(rows, g + 1), pack), rows)
        if (alt * row_bytes <= budget
                and _dual_core_cost(rows, alt) < _dual_core_cost(rows, tile)):
            tile = alt
    return max(tile, 1)


# ----------------------------------------------------------------------------
# Wrapper: forward pass of ShortCut: out = act(x + other).
# ----------------------------------------------------------------------------
def shortcut(x, other, activation: str = "leaky", quant: bool = False,
             donate_x: bool = True):
    """x, other: (B, C, H, W) arrays (NCHW, matching PyTorch).

    `quant=True` corresponds to FloatFunctional.add in float (non-converted)
    mode, which is numerically a plain float add, so both paths use the same
    kernel.  `donate_x=True` aliases x's buffer to the output (matching the
    in-place `x += other` semantics); under jit, donate x to avoid a copy.
    """
    # TODO(synk): converted int8 FloatFunctional.add (scale/zero-point requant) not implemented.
    del quant
    assert x.shape == other.shape, "shortcut requires matching shapes"
    assert x.dtype == other.dtype, "shortcut requires matching dtypes"
    assert jnp.issubdtype(x.dtype, jnp.floating), (
        "shortcut kernel supports floating dtypes only "
        "(int8-quantized add is not numerically a float add)")
    act_fn = ACTIVATION_MAP[activation]

    orig_shape = x.shape
    n = x.size
    itemsize = jnp.dtype(x.dtype).itemsize
    cols, needs_pad = _choose_cols(n)

    if needs_pad:
        # Rare fallback (no usable divisor of n): pad the flat tail.
        rows = _cdiv(n, cols)
        pad = rows * cols - n
        x2 = jnp.pad(x.reshape(-1), (0, pad)).reshape(rows, cols)
        o2 = jnp.pad(other.reshape(-1), (0, pad)).reshape(rows, cols)
    else:
        # Zero-extra-traffic view: rows * cols == n exactly.
        rows = n // cols
        x2 = x.reshape(rows, cols)
        o2 = other.reshape(rows, cols)

    tile_rows = _choose_tile_rows(rows, cols, itemsize)
    grid = (_cdiv(rows, tile_rows),)
    kernel = functools.partial(_shortcut_kernel, act_fn=act_fn)
    transcendentals = n if activation in ("logistic", "tanh") else 0

    out2 = pl.pallas_call(
        kernel,
        out_shape=jax.ShapeDtypeStruct((rows, cols), x.dtype),
        grid=grid,
        in_specs=[
            pl.BlockSpec((tile_rows, cols), lambda i: (i, 0)),
            pl.BlockSpec((tile_rows, cols), lambda i: (i, 0)),
        ],
        out_specs=pl.BlockSpec((tile_rows, cols), lambda i: (i, 0)),
        input_output_aliases={0: 0} if donate_x else {},
        compiler_params=pltpu.CompilerParams(
            dimension_semantics=("parallel",),
        ),
        cost_estimate=pl.CostEstimate(
            flops=2 * n,
            transcendentals=transcendentals,
            bytes_accessed=3 * n * itemsize,
        ),
    )(x2, o2)

    if needs_pad:
        return out2.reshape(-1)[:n].reshape(orig_shape)
    return out2.reshape(orig_shape)


# ----------------------------------------------------------------------------
# Pure-JAX reference for correctness checking.
# ----------------------------------------------------------------------------
def shortcut_ref(x, other, activation: str = "leaky"):
    v = x + other
    act_fn = ACTIVATION_MAP[activation]
    if act_fn is not None:
        v = act_fn(v)
    return v


if __name__ == "__main__":
    key = jax.random.PRNGKey(0)
    kx, ko, kx2, ko2, kx3, ko3 = jax.random.split(key, 6)

    ok = True

    # Small NCHW shape consistent with a conv-net shortcut connection.
    B, C, H, W = 2, 4, 16, 16
    x = jax.random.normal(kx, (B, C, H, W), dtype=jnp.float32)
    other = jax.random.normal(ko, (B, C, H, W), dtype=jnp.float32)
    for act in ["leaky", "linear", "relu", "relu+", "logistic", "tanh", "relu6"]:
        out = jax.block_until_ready(shortcut(x, other, activation=act))
        ref = shortcut_ref(x, other, activation=act)
        if not jnp.allclose(out, ref, atol=1e-5, rtol=1e-5):
            ok = False
            print(f"MISMATCH for activation={act} shape={(B, C, H, W)}")

    # quant=True (float-mode FloatFunctional.add) == plain float add.
    out = jax.block_until_ready(shortcut(x, other, activation="leaky", quant=True))
    if not jnp.allclose(out, shortcut_ref(x, other, activation="leaky"),
                        atol=1e-5, rtol=1e-5):
        ok = False
        print("MISMATCH for quant=True")

    # Awkward spatial size (13x13): exact-divisor masked-lane path, no padding.
    xb = jax.random.normal(kx2, (2, 4, 13, 13), dtype=jnp.float32)
    ob = jax.random.normal(ko2, (2, 4, 13, 13), dtype=jnp.float32)
    for act in ["leaky", "linear"]:
        out = jax.block_until_ready(shortcut(xb, ob, activation=act))
        ref = shortcut_ref(xb, ob, activation=act)
        if not jnp.allclose(out, ref, atol=1e-5, rtol=1e-5):
            ok = False
            print(f"MISMATCH for activation={act} shape={(2, 4, 13, 13)}")

    # Larger activation: exercises the multi-block (>=2) grid used for v7x
    # dual-core sharding.
    xc = jax.random.normal(kx3, (2, 64, 32, 32), dtype=jnp.float32)
    oc = jax.random.normal(ko3, (2, 64, 32, 32), dtype=jnp.float32)
    out = jax.block_until_ready(shortcut(xc, oc, activation="leaky"))
    if not jnp.allclose(out, shortcut_ref(xc, oc, activation="leaky"),
                        atol=1e-5, rtol=1e-5):
        ok = False
        print("MISMATCH for multi-block shape=(2, 64, 32, 32)")

    if ok:
        print("KERNEL_OK")
</pallas_src>

<mosaic_0001>
module attributes {stable_mosaic.version = 11 : i64} {
  func.func @_shortcut_kernel(%arg0: i32, %arg1: memref<2x1024xf32, #tpu.memory_space<vmem>>, %arg2: memref<2x1024xf32, #tpu.memory_space<vmem>>, %arg3: memref<2x1024xf32, #tpu.memory_space<vmem>>) attributes {dimension_semantics = [#tpu.dimension_semantics<parallel>], iteration_bounds = array<i64: 1>, scalar_prefetch = 0 : i64, scratch_operands = 0 : i64, tpu.core_type = #tpu.core_type<tc>, window_params = [{transform_indices = @transform_0, window_bounds = array<i64: 2, 1024>}, {transform_indices = @transform_1, window_bounds = array<i64: 2, 1024>}, {transform_indices = @transform_2, window_bounds = array<i64: 2, 1024>}]} {
    %c0 = arith.constant 0 : index
    %c0_0 = arith.constant 0 : index
    %0 = vector.load %arg1[%c0, %c0_0] : memref<2x1024xf32, #tpu.memory_space<vmem>>, vector<2x1024xf32>
    %c0_1 = arith.constant 0 : index
    %c0_2 = arith.constant 0 : index
    %1 = vector.load %arg2[%c0_1, %c0_2] : memref<2x1024xf32, #tpu.memory_space<vmem>>, vector<2x1024xf32>
    %2 = arith.addf %0, %1 : vector<2x1024xf32>
    %cst = arith.constant 0.000000e+00 : f32
    %3 = vector.broadcast %cst : f32 to vector<2x1024xf32>
    %4 = arith.cmpf oge, %2, %3 : vector<2x1024xf32>
    %cst_3 = arith.constant 1.000000e-01 : f32
    %5 = vector.broadcast %cst_3 : f32 to vector<2x1024xf32>
    %6 = arith.mulf %2, %5 : vector<2x1024xf32>
    %7 = arith.select %4, %2, %6 : vector<2x1024xi1>, vector<2x1024xf32>
    %c0_4 = arith.constant 0 : index
    %c0_5 = arith.constant 0 : index
    %8 = vector.load %arg3[%c0_4, %c0_5] : memref<2x1024xf32, #tpu.memory_space<vmem>>, vector<2x1024xf32>
    tpu.vector_store %arg3[%c0_4, %c0_5], %7 {strides = array<i32>} : memref<2x1024xf32, #tpu.memory_space<vmem>>, vector<2x1024xf32>,
    return
  }
  func.func @transform_0(%arg0: i32) -> (i32, i32) {
    %c0_i32 = arith.constant 0 : i32
    %c0_i32_0 = arith.constant 0 : i32
    return %arg0, %c0_i32 : i32, i32
  }
  func.func @transform_1(%arg0: i32) -> (i32, i32) {
    %c0_i32 = arith.constant 0 : i32
    %c0_i32_0 = arith.constant 0 : i32
    return %arg0, %c0_i32 : i32, i32
  }
  func.func @transform_2(%arg0: i32) -> (i32, i32) {
    %c0_i32 = arith.constant 0 : i32
    %c0_i32_0 = arith.constant 0 : i32
    return %arg0, %c0_i32 : i32, i32
  }
}

</mosaic_0001>

<bundles_post_ra>
// kernel: tpu_custom_call.1
= control target key start
LH: loop header
LB: loop body
LE: loop exit
PB: predicated region body
PF: predicated region fallthrough
CT: control target
= control target key end

     0   :  { %7 = vsyncpa [#allocation3], 0  ;;  %s128_s0 = inlined_call_operand.hbm [shape: f32[2,1024], index: 0, kind: input, shape index: {}, may-alias: {0,2}]   ;;  %s129_s1 = inlined_call_operand.vmem [shape: f32[2,1024], index: 1, kind: input, shape index: {}]   ;;  %s130_s2 = inlined_call_operand.hbm [shape: f32[2,1024], index: 2, kind: output, shape index: {}, may-alias: {0,2}]  }
   0x1   :  { %8 = vsyncpa [#allocation4], 0  ;;  %s99_s9 = smov [#allocation2]  }
   0x2   :  { %s15_s10 = sshll.u32 %s99_s9, 4  ;;  %s16_s10 = int_to_ptr.vmem [resolvable:$true] %s15_s10 }
   0x3   :  { %s63_s11 = scalar_lea.vmem %s16_s10, 256  ;;  %p68_p1 = scmp.lt.s32.totalorder %s16_s10, %s16_s10 }
   0x4   :  { %p64_p0 = scmp.ne.s32.totalorder %s16_s10, %s63_s11  ;;  %p69_p2 = scmp.lt.s32.totalorder %s63_s11, %s63_s11 }
   0x6   :  { %p70_p3 = por %p69_p2, %p68_p1 }
   0x8   :  { %p71_p4 = pnand %p70_p3, %p64_p0 }
   0xa   :  { %74 = shalt.err (!%p71_p4)
}
   0xb   :  { %18 = dma.hbm_to_vmem [thread:$0]  %s128_s0, 256, %s16_s10, [#allocation3]  }
   0xc   :  { %95 = dma.done.wait [#allocation3], 256  }
   0xd   :  { %96 = vsyncadd [#allocation3], 4294967040  ;;  %v24_v0 = vld [vmem:[#allocation2] sm:$0xff]  ;;  %v25_v2 = vld [vmem:[#allocation2 + $0x8] sm:$0xff]  ;;  %s100_s18 = smov [#allocation5]  }
   0xe   :  { %v26_v1 = vld [vmem:[%s129_s1] sm:$0xff]  ;;  %v27_v4 = vld [vmem:[%s129_s1 + $0x8] sm:$0xff]  ;;  %s44_s19 = sshll.u32 %s100_s18, 4  ;;  %s45_s19 = int_to_ptr.vmem [resolvable:$true] %s44_s19 }
   0xf   :  { %v28_v3 = vadd.f32 %v26_v1, %v24_v0  ;;  %v29_v5 = vadd.f32 %v27_v4, %v25_v2  ;;  %s75_s0 = scalar_lea.vmem %s45_s19, 256  ;;  %p80_p6 = scmp.lt.s32.totalorder %s45_s19, %s45_s19 }
  0x10   :  { %p76_p5 = scmp.ne.s32.totalorder %s45_s19, %s75_s0  ;;  %p81_p7 = scmp.lt.s32.totalorder %s75_s0, %s75_s0 }
  0x11   :  { %vm30_vm0 = vcmp.ge.f32.partialorder %v28_v3, 0.0  ;;  %v32_v6 = vmul.f32 0.1, %v28_v3  ;;  %vm31_vm1 = vcmp.ge.f32.partialorder %v29_v5, 0.0  ;;  %v33_v7 = vmul.f32 0.1, %v29_v5 }
  0x12   :  { %p82_p8 = por %p81_p7, %p80_p6 }
  0x13   :  { %v34_v8 = vsel %vm30_vm0, %v28_v3, %v32_v6  ;;  %v35_v9 = vsel %vm31_vm1, %v29_v5, %v33_v7 }
  0x14   :  { %36 = vst [vmem:[#allocation5] sm:$0xff] %v34_v8  ;;  %37 = vst [vmem:[#allocation5 + $0x8] sm:$0xff] %v35_v9  ;;  %p83_p9 = pnand %p82_p8, %p76_p5 }
  0x16   :  { %86 = shalt.err (!%p83_p9)
}
  0x17   :  { %47 = dma.vmem_to_hbm [thread:$0]  %s45_s19, 256, %s130_s2, [#allocation4]  }
  0x18   :  { %97 = dma.done.wait [#allocation4], 256  }
  0x19   :  { %98 = vsyncadd [#allocation4], 4294967040 }
  0x1a   :  { %51 = vsyncpa [#allocation3], 1 }
  0x1b   :  { %52 = vsyncpa [#allocation4], 1 }

</bundles_post_ra>
